<compile_context>
chip_gen: v7x
topology: tpu7x:2x2x1
jax: 0.10.0
libtpu: 0.0.40
codegen_flags: <defaults>
</compile_context>

<pallas_src>
import math
import functools

import jax
import jax.numpy as jnp
from jax.experimental import pallas as pl
from jax.experimental.pallas import tpu as pltpu


_VMEM_LIMIT_BYTES = 48 * 1024 * 1024  # safe on v5e/v6e (128 MiB) and v7x (64 MiB/TC)


def _pick_tile(dim, candidates):
    for t in candidates:
        if dim >= t and dim % t == 0:
            return t
    return dim  # full extent is always a legal block size


# ---------------------------------------------------------------------------
# Kernel 1: tiled dense projection  y = x @ W_t + b   (PyTorch nn.Linear semantics,
# with W_t = W.T pre-transposed in the wrapper so the MXU contraction needs no XLU)
# ---------------------------------------------------------------------------
def _linear_kernel(x_ref, w_ref, b_ref, o_ref, acc_ref):
    @pl.when(pl.program_id(2) == 0)
    def _():
        acc_ref[...] = jnp.zeros_like(acc_ref)

    acc_ref[...] += jnp.dot(
        x_ref[...].astype(jnp.bfloat16),
        w_ref[...].astype(jnp.bfloat16),
        preferred_element_type=jnp.float32,
    )

    @pl.when(pl.program_id(2) == pl.num_programs(2) - 1)
    def _():
        o_ref[...] = (acc_ref[...] + b_ref[...]).astype(o_ref.dtype)


def linear(x2d, w_t, b):
    """x2d: (M, Din); w_t: (Din, Dout) pre-transposed; b: (Dout,). Returns f32 (M, Dout)."""
    M, Din = x2d.shape
    Dout = w_t.shape[1]
    tm = _pick_tile(M, (512, 256, 128, 64, 32, 16, 8))
    tn = _pick_tile(Dout, (256, 128))
    tk = _pick_tile(Din, (512, 256, 128))
    grid = (M // tm, Dout // tn, Din // tk)

    return pl.pallas_call(
        _linear_kernel,
        out_shape=jax.ShapeDtypeStruct((M, Dout), jnp.float32),
        grid=grid,
        in_specs=[
            pl.BlockSpec((tm, tk), lambda i, j, k: (i, k)),
            pl.BlockSpec((tk, tn), lambda i, j, k: (k, j)),
            pl.BlockSpec((1, tn), lambda i, j, k: (0, j)),
        ],
        out_specs=pl.BlockSpec((tm, tn), lambda i, j, k: (i, j)),
        scratch_shapes=[pltpu.VMEM((tm, tn), jnp.float32)],
        compiler_params=pltpu.CompilerParams(
            dimension_semantics=("parallel", "parallel", "arbitrary"),
            vmem_limit_bytes=_VMEM_LIMIT_BYTES,
        ),
    )(x2d, w_t, b.reshape(1, Dout))


# ---------------------------------------------------------------------------
# Kernel 2: scaled-dot-product attention, all H heads of one batch element per
# grid step; lane-dense (S, H*d_k) output store.
# ---------------------------------------------------------------------------
def _mha_kernel(q_ref, k_ref, v_ref, o_ref, *, inv_scale, num_heads):
    # blocks are (1, H, S, d_k)
    q = (q_ref[0].astype(jnp.float32) * inv_scale).astype(jnp.bfloat16)   # (H, S, dk)
    k = k_ref[0].astype(jnp.bfloat16)                                     # (H, S, dk)
    v = v_ref[0].astype(jnp.bfloat16)                                     # (H, S, dk)

    s = jnp.einsum("hqd,hkd->hqk", q, k,
                   preferred_element_type=jnp.float32)                    # (H, S, S) f32
    s = s - jnp.max(s, axis=-1, keepdims=True)
    p = jnp.exp(s)
    p = p * pl.reciprocal(jnp.sum(p, axis=-1, keepdims=True), approx=True)

    ctx = jnp.einsum("hqk,hkd->hqd", p.astype(jnp.bfloat16), v,
                     preferred_element_type=jnp.float32)                  # (H, S, dk)

    # head-merge inside VMEM -> lane-dense (S, H*dk) store (last dim = d_model)
    o_ref[0] = jnp.concatenate(
        [ctx[h] for h in range(num_heads)], axis=-1).astype(o_ref.dtype)


def attention(q_bhsd, k_bhsd, v_bhsd):
    # TODO(synk): for large S switch to flash-style kv tiling (online softmax with
    # m/l/acc scratch, kv grid axis "arbitrary") so the (H, S, S) score block never
    # exceeds VMEM (notably on v7x's 64 MiB).
    B, H, S, dk = q_bhsd.shape
    D = H * dk
    inv_scale = 1.0 / math.sqrt(dk)
    in_spec = pl.BlockSpec((1, H, S, dk), lambda b: (b, 0, 0, 0))
    return pl.pallas_call(
        functools.partial(_mha_kernel, inv_scale=inv_scale, num_heads=H),
        out_shape=jax.ShapeDtypeStruct((B, S, D), jnp.float32),
        grid=(B,),
        in_specs=[in_spec, in_spec, in_spec],
        out_specs=pl.BlockSpec((1, S, D), lambda b: (b, 0, 0)),
        compiler_params=pltpu.CompilerParams(
            dimension_semantics=("parallel",),
            vmem_limit_bytes=_VMEM_LIMIT_BYTES,
        ),
    )(q_bhsd, k_bhsd, v_bhsd)


# ---------------------------------------------------------------------------
# MultiHeadAttention forward (glue in plain JAX, hot paths in Pallas)
# ---------------------------------------------------------------------------
def _heads_bhsd(x2d, S, B, H, dk):
    # (S*B, D) -> (B, H, S, dk)   (matches .view(S,B,H,dk).permute(1,2,0,3))
    return x2d.reshape(S, B, H, dk).transpose(1, 2, 0, 3)


def _output_projection(ctx_bsd, wo_t, bo, S, B, D):
    # ctx: (B, S, D) lane-dense; Wo is row-wise, so project first, transpose last.
    out = linear(ctx_bsd.reshape(B * S, D).astype(jnp.bfloat16), wo_t, bo)
    return out.reshape(B, S, D).transpose(1, 0, 2)            # (S, B, D)


def multi_head_attention(q, k, v, fparams, num_heads):
    """General MHA with distinct q/k/v (matches the PyTorch forward exactly)."""
    S, B, D = q.shape
    dk = D // num_heads
    Q = linear(q.reshape(S * B, D).astype(jnp.bfloat16), fparams["wq_t"], fparams["bq"])
    K = linear(k.reshape(S * B, D).astype(jnp.bfloat16), fparams["wk_t"], fparams["bk"])
    V = linear(v.reshape(S * B, D).astype(jnp.bfloat16), fparams["wv_t"], fparams["bv"])
    ctx = attention(_heads_bhsd(Q, S, B, num_heads, dk),
                    _heads_bhsd(K, S, B, num_heads, dk),
                    _heads_bhsd(V, S, B, num_heads, dk))
    return _output_projection(ctx, fparams["wo_t"], fparams["bo"], S, B, D)


def multi_head_self_attention(x, fparams, num_heads):
    """Self-attention fast path (q = k = v = x): one fused QKV projection."""
    S, B, D = x.shape
    dk = D // num_heads
    qkv = linear(x.reshape(S * B, D).astype(jnp.bfloat16),
                 fparams["w_qkv_t"], fparams["b_qkv"])        # (S*B, 3D)
    Q, K, V = jnp.split(qkv, 3, axis=-1)
    ctx = attention(_heads_bhsd(Q, S, B, num_heads, dk),
                    _heads_bhsd(K, S, B, num_heads, dk),
                    _heads_bhsd(V, S, B, num_heads, dk))
    return _output_projection(ctx, fparams["wo_t"], fparams["bo"], S, B, D)


# ---------------------------------------------------------------------------
# Parameters (PyTorch nn.Linear layout + kernel-ready pre-transposed/fused copies)
# ---------------------------------------------------------------------------
def init_params(key, d_model):
    bound = 1.0 / math.sqrt(d_model)
    names = ["wq", "bq", "wk", "bk", "wv", "bv", "wo", "bo"]
    keys = jax.random.split(key, len(names))
    params = {}
    for name, kk in zip(names, keys):
        shape = (d_model, d_model) if name.startswith("w") else (d_model,)
        params[name] = jax.random.uniform(
            kk, shape, jnp.float32, minval=-bound, maxval=bound)
    return params


def prepare_params(params):
    """Pre-transpose to (Din, Dout), cast weights to bf16, stack fused QKV."""
    return {
        "wq_t": params["wq"].T.astype(jnp.bfloat16),
        "wk_t": params["wk"].T.astype(jnp.bfloat16),
        "wv_t": params["wv"].T.astype(jnp.bfloat16),
        "wo_t": params["wo"].T.astype(jnp.bfloat16),
        "bq": params["bq"].astype(jnp.float32),
        "bk": params["bk"].astype(jnp.float32),
        "bv": params["bv"].astype(jnp.float32),
        "bo": params["bo"].astype(jnp.float32),
        "w_qkv_t": jnp.concatenate(
            [params["wq"], params["wk"], params["wv"]], axis=0).T.astype(jnp.bfloat16),
        "b_qkv": jnp.concatenate(
            [params["bq"], params["bk"], params["bv"]]).astype(jnp.float32),
    }


# Pure-JAX fp32 reference for sanity checking
def reference_mha(q, k, v, params, num_heads):
    S, B, D = q.shape
    d_k = D // num_heads
    scale = math.sqrt(d_k)

    def lin(x, w, b):
        return x @ w.T + b

    Q = lin(q, params["wq"], params["bq"]).reshape(S, B, num_heads, d_k).transpose(1, 2, 0, 3)
    K = lin(k, params["wk"], params["bk"]).reshape(S, B, num_heads, d_k).transpose(1, 2, 0, 3)
    V = lin(v, params["wv"], params["bv"]).reshape(S, B, num_heads, d_k).transpose(1, 2, 0, 3)
    scores = jnp.einsum("bhqd,bhkd->bhqk", Q, K) / scale
    attn = jax.nn.softmax(scores, axis=-1)
    ctx = jnp.einsum("bhqk,bhkd->bhqd", attn, V)
    ctx = ctx.transpose(2, 0, 1, 3).reshape(S, B, D)
    return lin(ctx, params["wo"], params["bo"])


if __name__ == "__main__":
    S, B, d_model, num_heads = 8, 2, 32, 4

    key = jax.random.PRNGKey(0)
    kq, kk, kv, kx, kp = jax.random.split(key, 5)
    q = jax.random.normal(kq, (S, B, d_model), jnp.float32)
    k = jax.random.normal(kk, (S, B, d_model), jnp.float32)
    v = jax.random.normal(kv, (S, B, d_model), jnp.float32)
    x = jax.random.normal(kx, (S, B, d_model), jnp.float32)

    params = init_params(kp, d_model)
    fparams = prepare_params(params)

    mha = jax.jit(multi_head_attention, static_argnums=(4,))
    self_mha = jax.jit(multi_head_self_attention, static_argnums=(2,))

    out = jax.block_until_ready(mha(q, k, v, fparams, num_heads))
    out_self = jax.block_until_ready(self_mha(x, fparams, num_heads))

    ref = reference_mha(q, k, v, params, num_heads)
    ref_self = reference_mha(x, x, x, params, num_heads)

    assert out.shape == (S, B, d_model)
    assert out_self.shape == (S, B, d_model)
    # bf16 MXU inputs + approx-reciprocal softmax => slightly looser tolerance vs fp32 ref
    assert jnp.allclose(out, ref, atol=5e-2, rtol=5e-2), \
        float(jnp.max(jnp.abs(out - ref)))
    assert jnp.allclose(out_self, ref_self, atol=5e-2, rtol=5e-2), \
        float(jnp.max(jnp.abs(out_self - ref_self)))

    print("KERNEL_OK")
</pallas_src>

<mosaic_0001>
module attributes {stable_mosaic.version = 11 : i64} {
  func.func @_linear_kernel(%arg0: i32, %arg1: i32, %arg2: i32, %arg3: memref<16x32xbf16, #tpu.memory_space<vmem>>, %arg4: memref<32x32xbf16, #tpu.memory_space<vmem>>, %arg5: memref<1x32xf32, #tpu.memory_space<vmem>>, %arg6: memref<16x32xf32, #tpu.memory_space<vmem>>, %arg7: memref<16x32xf32, #tpu.memory_space<vmem>>) attributes {dimension_semantics = [#tpu.dimension_semantics<parallel>, #tpu.dimension_semantics<parallel>, #tpu.dimension_semantics<arbitrary>], iteration_bounds = array<i64: 1, 1, 1>, scalar_prefetch = 0 : i64, scratch_operands = 1 : i64, tpu.core_type = #tpu.core_type<tc>, window_params = [{transform_indices = @transform_0, window_bounds = array<i64: 16, 32>}, {transform_indices = @transform_1, window_bounds = array<i64: 32, 32>}, {transform_indices = @transform_2, window_bounds = array<i64: 1, 32>}, {transform_indices = @transform_3, window_bounds = array<i64: 16, 32>}]} {
    %c0_i32 = arith.constant 0 : i32
    %0 = arith.cmpi eq, %arg2, %c0_i32 : i32
    %1 = arith.extui %0 : i1 to i32
    %c0_i32_0 = arith.constant 0 : i32
    %2 = arith.cmpi ne, %1, %c0_i32_0 : i32
    scf.if %2 {
      %cst_10 = arith.constant 0.000000e+00 : f32
      %12 = vector.broadcast %cst_10 : f32 to vector<16x32xf32>
      %c0_11 = arith.constant 0 : index
      %c0_12 = arith.constant 0 : index
      %13 = vector.load %arg7[%c0_11, %c0_12] : memref<16x32xf32, #tpu.memory_space<vmem>>, vector<16x32xf32>
      tpu.vector_store %arg7[%c0_11, %c0_12], %12 {strides = array<i32>} : memref<16x32xf32, #tpu.memory_space<vmem>>, vector<16x32xf32>,
    } else {
    }
    %c0 = arith.constant 0 : index
    %c0_1 = arith.constant 0 : index
    %3 = vector.load %arg7[%c0, %c0_1] : memref<16x32xf32, #tpu.memory_space<vmem>>, vector<16x32xf32>
    %c0_2 = arith.constant 0 : index
    %c0_3 = arith.constant 0 : index
    %4 = vector.load %arg3[%c0_2, %c0_3] : memref<16x32xbf16, #tpu.memory_space<vmem>>, vector<16x32xbf16>
    %c0_4 = arith.constant 0 : index
    %c0_5 = arith.constant 0 : index
    %5 = vector.load %arg4[%c0_4, %c0_5] : memref<32x32xbf16, #tpu.memory_space<vmem>>, vector<32x32xbf16>
    %cst = arith.constant dense<0.000000e+00> : vector<16x32xf32>
    %6 = tpu.matmul %4, %5, %cst {dimension_numbers = #tpu.dot_dimension_numbers<[1], [0], [0], [1], [0, 0, 1, 1], [], []>} : vector<16x32xbf16>, vector<32x32xbf16>, vector<16x32xf32> -> vector<16x32xf32>
    %7 = arith.addf %3, %6 : vector<16x32xf32>
    %c0_6 = arith.constant 0 : index
    %c0_7 = arith.constant 0 : index
    %8 = vector.load %arg7[%c0_6, %c0_7] : memref<16x32xf32, #tpu.memory_space<vmem>>, vector<16x32xf32>
    tpu.vector_store %arg7[%c0_6, %c0_7], %7 {strides = array<i32>} : memref<16x32xf32, #tpu.memory_space<vmem>>, vector<16x32xf32>,
    %c0_i32_8 = arith.constant 0 : i32
    %9 = arith.cmpi eq, %arg2, %c0_i32_8 : i32
    %10 = arith.extui %9 : i1 to i32
    %c0_i32_9 = arith.constant 0 : i32
    %11 = arith.cmpi ne, %10, %c0_i32_9 : i32
    scf.if %11 {
      %c0_10 = arith.constant 0 : index
      %c0_11 = arith.constant 0 : index
      %12 = vector.load %arg7[%c0_10, %c0_11] : memref<16x32xf32, #tpu.memory_space<vmem>>, vector<16x32xf32>
      %c0_12 = arith.constant 0 : index
      %c0_13 = arith.constant 0 : index
      %13 = vector.load %arg5[%c0_12, %c0_13] : memref<1x32xf32, #tpu.memory_space<vmem>>, vector<1x32xf32>
      %14 = vector.broadcast %13 : vector<1x32xf32> to vector<16x32xf32>
      %15 = arith.addf %12, %14 : vector<16x32xf32>
      %c0_14 = arith.constant 0 : index
      %c0_15 = arith.constant 0 : index
      %16 = vector.load %arg6[%c0_14, %c0_15] : memref<16x32xf32, #tpu.memory_space<vmem>>, vector<16x32xf32>
      tpu.vector_store %arg6[%c0_14, %c0_15], %15 {strides = array<i32>} : memref<16x32xf32, #tpu.memory_space<vmem>>, vector<16x32xf32>,
    } else {
    }
    return
  }
  func.func @transform_0(%arg0: i32, %arg1: i32, %arg2: i32) -> (i32, i32) {
    %c0_i32 = arith.constant 0 : i32
    return %arg0, %arg2 : i32, i32
  }
  func.func @transform_1(%arg0: i32, %arg1: i32, %arg2: i32) -> (i32, i32) {
    %c0_i32 = arith.constant 0 : i32
    return %arg2, %arg1 : i32, i32
  }
  func.func @transform_2(%arg0: i32, %arg1: i32, %arg2: i32) -> (i32, i32) {
    %c0_i32 = arith.constant 0 : i32
    %c0_i32_0 = arith.constant 0 : i32
    return %c0_i32, %arg1 : i32, i32
  }
  func.func @transform_3(%arg0: i32, %arg1: i32, %arg2: i32) -> (i32, i32) {
    %c0_i32 = arith.constant 0 : i32
    return %arg0, %arg1 : i32, i32
  }
}

module attributes {stable_mosaic.version = 11 : i64} {
  func.func @_mha_kernel(%arg0: i32, %arg1: memref<1x4x8x8xf32, #tpu.memory_space<vmem>>, %arg2: memref<1x4x8x8xf32, #tpu.memory_space<vmem>>, %arg3: memref<1x4x8x8xf32, #tpu.memory_space<vmem>>, %arg4: memref<1x8x32xf32, #tpu.memory_space<vmem>>) attributes {dimension_semantics = [#tpu.dimension_semantics<parallel>], iteration_bounds = array<i64: 2>, scalar_prefetch = 0 : i64, scratch_operands = 0 : i64, tpu.core_type = #tpu.core_type<tc>, window_params = [{transform_indices = @transform_0, window_bounds = array<i64: 1, 4, 8, 8>}, {transform_indices = @transform_1, window_bounds = array<i64: 1, 4, 8, 8>}, {transform_indices = @transform_2, window_bounds = array<i64: 1, 4, 8, 8>}, {transform_indices = @transform_3, window_bounds = array<i64: 1, 8, 32>}]} {
    %c0 = arith.constant 0 : index
    %c0_0 = arith.constant 0 : index
    %c0_1 = arith.constant 0 : index
    %c0_2 = arith.constant 0 : index
    %0 = vector.load %arg1[%c0, %c0_0, %c0_1, %c0_2] : memref<1x4x8x8xf32, #tpu.memory_space<vmem>>, vector<1x4x8x8xf32>
    %1 = vector.shape_cast %0 : vector<1x4x8x8xf32> to vector<4x8x8xf32>
    %cst = arith.constant 0.353553385 : f32
    %2 = vector.broadcast %cst : f32 to vector<4x8x8xf32>
    %3 = arith.mulf %1, %2 : vector<4x8x8xf32>
    %4 = arith.truncf %3 : vector<4x8x8xf32> to vector<4x8x8xbf16>
    %c0_3 = arith.constant 0 : index
    %c0_4 = arith.constant 0 : index
    %c0_5 = arith.constant 0 : index
    %c0_6 = arith.constant 0 : index
    %5 = vector.load %arg2[%c0_3, %c0_4, %c0_5, %c0_6] : memref<1x4x8x8xf32, #tpu.memory_space<vmem>>, vector<1x4x8x8xf32>
    %6 = vector.shape_cast %5 : vector<1x4x8x8xf32> to vector<4x8x8xf32>
    %7 = arith.truncf %6 : vector<4x8x8xf32> to vector<4x8x8xbf16>
    %c0_7 = arith.constant 0 : index
    %c0_8 = arith.constant 0 : index
    %c0_9 = arith.constant 0 : index
    %c0_10 = arith.constant 0 : index
    %8 = vector.load %arg3[%c0_7, %c0_8, %c0_9, %c0_10] : memref<1x4x8x8xf32, #tpu.memory_space<vmem>>, vector<1x4x8x8xf32>
    %9 = vector.shape_cast %8 : vector<1x4x8x8xf32> to vector<4x8x8xf32>
    %10 = arith.truncf %9 : vector<4x8x8xf32> to vector<4x8x8xbf16>
    "tpu.trace_start"() <{level = 10 : i32, message = "hqd,hkd->hqk"}> : () -> ()
    %cst_11 = arith.constant dense<0.000000e+00> : vector<4x8x8xf32>
    %11 = tpu.matmul %4, %7, %cst_11 {dimension_numbers = #tpu.dot_dimension_numbers<[2], [2], [1], [1], [0, 0, 0, 1, 1, 1], [0], [0]>} : vector<4x8x8xbf16>, vector<4x8x8xbf16>, vector<4x8x8xf32> -> vector<4x8x8xf32>
    "tpu.trace_stop"() : () -> ()
    %cst_12 = arith.constant dense<0xFF800000> : vector<4x8xf32>
    %12 = vector.multi_reduction <maximumf>, %11, %cst_12 [2] : vector<4x8x8xf32> to vector<4x8xf32>
    %13 = vector.shape_cast %12 : vector<4x8xf32> to vector<4x8x1xf32>
    %14 = vector.broadcast %13 : vector<4x8x1xf32> to vector<4x8x8xf32>
    %15 = arith.subf %11, %14 : vector<4x8x8xf32>
    %16 = math.exp %15 : vector<4x8x8xf32>
    %cst_13 = arith.constant dense<0.000000e+00> : vector<4x8xf32>
    %17 = vector.multi_reduction <add>, %16, %cst_13 [2] : vector<4x8x8xf32> to vector<4x8xf32>
    %18 = vector.shape_cast %17 : vector<4x8xf32> to vector<4x8x1xf32>
    %19 = tpu.reciprocal %18 {approx = true} : vector<4x8x1xf32> -> vector<4x8x1xf32>
    %20 = vector.broadcast %19 : vector<4x8x1xf32> to vector<4x8x8xf32>
    %21 = arith.mulf %16, %20 : vector<4x8x8xf32>
    %22 = arith.truncf %21 : vector<4x8x8xf32> to vector<4x8x8xbf16>
    "tpu.trace_start"() <{level = 10 : i32, message = "hqk,hkd->hqd"}> : () -> ()
    %cst_14 = arith.constant dense<0.000000e+00> : vector<4x8x8xf32>
    %23 = tpu.matmul %22, %10, %cst_14 {dimension_numbers = #tpu.dot_dimension_numbers<[2], [1], [1], [2], [0, 0, 0, 1, 1, 2], [0], [0]>} : vector<4x8x8xbf16>, vector<4x8x8xbf16>, vector<4x8x8xf32> -> vector<4x8x8xf32>
    "tpu.trace_stop"() : () -> ()
    %24 = vector.extract_strided_slice %23 {offsets = [0, 0, 0], sizes = [1, 8, 8], strides = [1, 1, 1]} : vector<4x8x8xf32> to vector<1x8x8xf32>
    %25 = vector.shape_cast %24 : vector<1x8x8xf32> to vector<8x8xf32>
    %26 = vector.extract_strided_slice %23 {offsets = [1, 0, 0], sizes = [1, 8, 8], strides = [1, 1, 1]} : vector<4x8x8xf32> to vector<1x8x8xf32>
    %27 = vector.shape_cast %26 : vector<1x8x8xf32> to vector<8x8xf32>
    %28 = vector.extract_strided_slice %23 {offsets = [2, 0, 0], sizes = [1, 8, 8], strides = [1, 1, 1]} : vector<4x8x8xf32> to vector<1x8x8xf32>
    %29 = vector.shape_cast %28 : vector<1x8x8xf32> to vector<8x8xf32>
    %30 = vector.extract_strided_slice %23 {offsets = [3, 0, 0], sizes = [1, 8, 8], strides = [1, 1, 1]} : vector<4x8x8xf32> to vector<1x8x8xf32>
    %31 = vector.shape_cast %30 : vector<1x8x8xf32> to vector<8x8xf32>
    %32 = tpu.concatenate %25, %27, %29, %31 in 1 : vector<8x8xf32>, vector<8x8xf32>, vector<8x8xf32>, vector<8x8xf32> -> vector<8x32xf32>
    %c0_15 = arith.constant 0 : index
    %c0_16 = arith.constant 0 : index
    %c0_17 = arith.constant 0 : index
    %33 = vector.load %arg4[%c0_15, %c0_16, %c0_17] : memref<1x8x32xf32, #tpu.memory_space<vmem>>, vector<1x8x32xf32>
    %34 = vector.shape_cast %33 : vector<1x8x32xf32> to vector<8x32xf32>
    %35 = vector.shape_cast %32 : vector<8x32xf32> to vector<1x8x32xf32>
    tpu.vector_store %arg4[%c0_15, %c0_16, %c0_17], %35 {strides = array<i32>} : memref<1x8x32xf32, #tpu.memory_space<vmem>>, vector<1x8x32xf32>,
    return
  }
  func.func @transform_0(%arg0: i32) -> (i32, i32, i32, i32) {
    %c0_i32 = arith.constant 0 : i32
    %c0_i32_0 = arith.constant 0 : i32
    %c0_i32_1 = arith.constant 0 : i32
    %c0_i32_2 = arith.constant 0 : i32
    return %arg0, %c0_i32, %c0_i32_0, %c0_i32_1 : i32, i32, i32, i32
  }
  func.func @transform_1(%arg0: i32) -> (i32, i32, i32, i32) {
    %c0_i32 = arith.constant 0 : i32
    %c0_i32_0 = arith.constant 0 : i32
    %c0_i32_1 = arith.constant 0 : i32
    %c0_i32_2 = arith.constant 0 : i32
    return %arg0, %c0_i32, %c0_i32_0, %c0_i32_1 : i32, i32, i32, i32
  }
  func.func @transform_2(%arg0: i32) -> (i32, i32, i32, i32) {
    %c0_i32 = arith.constant 0 : i32
    %c0_i32_0 = arith.constant 0 : i32
    %c0_i32_1 = arith.constant 0 : i32
    %c0_i32_2 = arith.constant 0 : i32
    return %arg0, %c0_i32, %c0_i32_0, %c0_i32_1 : i32, i32, i32, i32
  }
  func.func @transform_3(%arg0: i32) -> (i32, i32, i32) {
    %c0_i32 = arith.constant 0 : i32
    %c0_i32_0 = arith.constant 0 : i32
    %c0_i32_1 = arith.constant 0 : i32
    return %arg0, %c0_i32, %c0_i32_0 : i32, i32, i32
  }
}

</mosaic_0001>

<bundles_post_ra>
// kernel: multi_head_attention.6
= control target key start
LH: loop header
LB: loop body
LE: loop exit
PB: predicated region body
PF: predicated region fallthrough
CT: control target
= control target key end

     0   :  { %vm19_vm0 = vcmask 261120   ;;  %v137_v0 = vmov 0.0   ;;  %vm138_vm1 = vmmov 0   ;;  %s184_s1 = inlined_call_operand.vmem [shape: bf16[32,32], index: 1, kind: input, shape index: {}]   ;;  %s185_s0 = inlined_call_operand.vmem [shape: bf16[16,32], index: 0, kind: input, shape index: {}]   ;;  %s186_s2 = inlined_call_operand.vmem [shape: f32[1,32], index: 2, kind: input, shape index: {}]   ;;  %s187_s3 = inlined_call_operand.vmem [shape: f32[16,32], index: 3, kind: output, shape index: {}]  }
   0x1   :  { %124 = vmatprep.subr.bf16.mxu0 %v137_v0  ;;  %v134_v1 = vld [vmem:[%s184_s1] sm:$0xff]   ;;  %128 = vmatprep.mubr.msk.bf16.mxu0 %vm138_vm1, %v137_v0  ;;  %20 = vst.msk [vmem:[#allocation2] sm:$0xff] %vm19_vm0, %v137_v0  ;;  %21 = vst.msk [vmem:[#allocation2 + $0x8] sm:$0xff] %vm19_vm0, %v137_v0  ;;  %v135_v2 = vld [vmem:[%s184_s1 + $0x8] sm:$0xff]  }
   0x2   :  { %125 = vmatpush3.bf16.msra.mxu0 %v134_v1  ;;  %v136_v3 = vld [vmem:[%s185_s0] sm:$0xff]  }
   0x3   :  { %126 = vmatprep.subr.bf16.mxu0 %v137_v0  ;;  %v120_v12 = vld [vmem:[%s186_s2] ss:$0 sm:$0xff] }
   0x6   :  { %127 = vmatpush3.bf16.msra.mxu0 %v135_v2 }
   0x8   :  { %v22_v4 = vld [vmem:[#allocation2] sm:$0xff]  ;;  %v23_v6 = vld [vmem:[#allocation2 + $0x8] sm:$0xff] }
   0x9   :  { %129 = vmatmul.mubr.msk.bf16.vlgmr.msra.gmra.mrb[0].mxu0 %vm19_vm0, %v136_v3 }
  0xdc   :  { %v85_v5 = vpop.f32.mrb[0].mxu0 }
  0xdd   :  { %v92_v7 = vadd.f32 %v85_v5, %v22_v4  ;;  %v130_v8 = vpop.f32.mrb[1].mxu0 }
  0xde   :  { %v88_v9 = vpop.f32.mrb[2].mxu0 }
  0xdf   :  { %94 = vst.msk [vmem:[#allocation2] sm:$0xff] %vm19_vm0, %v92_v7  ;;  %v93_v10 = vadd.f32 %v88_v9, %v23_v6  ;;  %v131_v11 = vpop.f32.mrb[3].mxu0 }
  0xe1   :  { %95 = vst.msk [vmem:[#allocation2 + $0x8] sm:$0xff] %vm19_vm0, %v93_v10 }
  0xe6   :  { %v99_v13 = vld [vmem:[#allocation2] sm:$0xff] }
  0xe7   :  { %v108_v14 = vadd.f32 %v120_v12, %v99_v13 }
  0xe8   :  { %v100_v15 = vld [vmem:[#allocation2 + $0x8] sm:$0xff] }
  0xe9   :  { %110 = vst.msk [vmem:[%s187_s3] sm:$0xff] %vm19_vm0, %v108_v14  ;;  %v109_v16 = vadd.f32 %v120_v12, %v100_v15 }
  0xeb   :  { %111 = vst.msk [vmem:[%s187_s3 + $0x8] sm:$0xff] %vm19_vm0, %v109_v16 }

// kernel: multi_head_attention.8
= control target key start
LH: loop header
LB: loop body
LE: loop exit
PB: predicated region body
PF: predicated region fallthrough
CT: control target
= control target key end

     0   :  { %s903_s12 = smov 0   ;;  %s980_s0 = inlined_call_operand.vmem [shape: f32[2,4,8,8], index: 0, kind: input, shape index: {}]   ;;  %s981_s1 = inlined_call_operand.vmem [shape: f32[2,4,8,8], index: 1, kind: input, shape index: {}]   ;;  %s982_s2 = inlined_call_operand.vmem [shape: f32[2,4,8,8], index: 2, kind: input, shape index: {}]   ;;  %s983_s3 = inlined_call_operand.vmem [shape: f32[2,8,32], index: 3, kind: output, shape index: {}]  }
   0x1 LB: > { %s752_s13 = sadd.s32 4294967295, %s876_s12   ;;  %p756_p0 = scmp.ge.s32.totalorder %s876_s12, 1  ;;  %s876_s12 = sphi %s903_s12, %s13_s12  }
   0x2   : > { %p157_p1 = scmp.lt.s32.totalorder %s876_s12, 3 }
   0x4   : > { %p158_p2 = pnand %p756_p0, %p157_p1 }
   0x5   : > { %p190_p3 = scmp.lt.s32.totalorder (!%p158_p2), %s752_s13, 1  ;;  %v878_v0 = vmov (!%p158_p2), 0.0   ;;  %vm879_vm0 = vmmov (!%p158_p2), 0   ;;  %vm238_vm1 = vcmask (!%p158_p2), 64512   ;;  %vm474_vm2 = vcmask (!%p158_p2), 1043456   ;;  %s880_s24 = smov (!%p158_p2), 8  }
   0x6   : > { %161 = sbr.rel (%p158_p2) target bundleno = 896 (0x380), region = 32  ;;  %793 = vmatprep.subr.bf16.mxu0 (!%p158_p2), %v878_v0  ;;  %799 = vmatprep.subr.bf16.mxu1 (!%p158_p2), %v878_v0  ;;  %s881_s25 = smov (!%p158_p2), 16   ;;  %vm669_vm3 = vcmask (!%p158_p2), 130048   ;;  %vm671_vm4 = vcmask (!%p158_p2), 195584   ;;  %vm673_vm5 = vcmask (!%p158_p2), 261120  }
   0x7   : > { %795 = vmatprep.mubr.msk.bf16.mxu0 (!%p158_p2), %vm879_vm0, %v878_v0  ;;  %801 = vmatprep.mubr.msk.bf16.mxu1 (!%p158_p2), %vm879_vm0, %v878_v0  ;;  %s882_s26 = smov (!%p158_p2), 24  }
   0xd   : > { %s985_s13 = smov (!%p190_p3, %s752_s13), 1 }
   0xe   : > { %s920_s14 = sshll.u32 %s985_s13, 5  ;;  %s763_s27 = sshll.u32 %s985_s13, 3 }
   0xf   : > { %s194_s17 = scalar_lea.vmem %s980_s0, %s920_s14  ;;  %s199_s20 = scalar_lea.vmem %s981_s1, %s920_s14 }
  0x10   : > { %v222_v1 = vld [vmem:[%s199_s20] sm:$0xff]  ;;  %v223_v2 = vld [vmem:[%s199_s20 + $0x8] sm:$0xff]  ;;  %v224_v7 = vld [vmem:[%s199_s20 + $0x10] sm:$0xff]  ;;  %s204_s23 = scalar_lea.vmem %s982_s2, %s920_s14  ;;  %s208_s30 = scalar_lea.vmem %s983_s3, %s763_s27 }
  0x11   : > { %v210_v3 = vld [vmem:[%s194_s17] sm:$0xff]  ;;  %v226_v4 = vpack.c.bf16 %v222_v1, %v222_v1  ;;  %v227_v5 = vpack.c.bf16 %v223_v2, %v223_v2  ;;  %v211_v6 = vld [vmem:[%s194_s17 + $0x8] sm:$0xff]  ;;  %v225_v8 = vld [vmem:[%s199_s20 + $0x18] sm:$0xff]  ;;  %v228_v13 = vpack.c.bf16 %v224_v7, %v224_v7 }
  0x12   : > { %v214_v11 = vmul.f32 0.35355338, %v210_v3  ;;  %v215_v12 = vmul.f32 0.35355338, %v211_v6  ;;  %v229_v14 = vpack.c.bf16 %v225_v8, %v225_v8  ;;  %v212_v17 = vld [vmem:[%s194_s17 + $0x10] sm:$0xff]  ;;  %v213_v18 = vld [vmem:[%s194_s17 + $0x18] sm:$0xff] }
  0x13   : > { %v243_v9 = vsel %vm238_vm1, %v226_v4, 0  ;;  %v289_v10 = vsel %vm238_vm1, %v227_v5, 0  ;;  %v335_v19 = vsel %vm238_vm1, %v228_v13, 0  ;;  %v216_v21 = vmul.f32 0.35355338, %v212_v17  ;;  %v230_v2 = vld [vmem:[%s204_s23] sm:$0xff] }
  0x14   : > { %794 = vmatpush3.bf16.xpose.msra.mxu0 %v243_v9  ;;  %800 = vmatpush3.bf16.xpose.msra.mxu1 %v289_v10  ;;  %v218_v15 = vpack.c.bf16 %v214_v11, %v214_v11  ;;  %v219_v16 = vpack.c.bf16 %v215_v12, %v215_v12  ;;  %v381_v20 = vsel %vm238_vm1, %v229_v14, 0  ;;  %v217_v22 = vmul.f32 0.35355338, %v213_v18  ;;  %v231_v5 = vld [vmem:[%s204_s23 + $0x8] sm:$0xff]  ;;  %v232_v8 = vld [vmem:[%s204_s23 + $0x10] sm:$0xff]  ;;  %v233_v11 = vld [vmem:[%s204_s23 + $0x18] sm:$0xff] }
  0x15   : > { %805 = vmatprep.subr.bf16.mxu0 %v878_v0  ;;  %811 = vmatprep.subr.bf16.mxu1 %v878_v0  ;;  %v220_v23 = vpack.c.bf16 %v216_v21, %v216_v21  ;;  %v234_v3 = vpack.c.bf16 %v230_v2, %v230_v2  ;;  %v235_v6 = vpack.c.bf16 %v231_v5, %v231_v5 }
  0x16   : > { %v221_v24 = vpack.c.bf16 %v217_v22, %v217_v22  ;;  %v236_v9 = vpack.c.bf16 %v232_v8, %v232_v8  ;;  %v237_v12 = vpack.c.bf16 %v233_v11, %v233_v11 }
  0x17   : > { %v476_v4 = vsel %vm474_vm2, %v234_v3, 0  ;;  %v522_v7 = vsel %vm474_vm2, %v235_v6, 0 }
  0x18   : > { %v568_v10 = vsel %vm474_vm2, %v236_v9, 0  ;;  %v614_v13 = vsel %vm474_vm2, %v237_v12, 0 }
  0x1b   : > { %796 = vmatmul.mubr.msk.bf16.vlgmr.msra.gmra.mrb[0].mxu0 %vm238_vm1, %v218_v15  ;;  %802 = vmatmul.mubr.msk.bf16.vlgmr.msra.gmra.mrb[0].mxu1 %vm238_vm1, %v219_v16 }
  0x1c   : > { %806 = vmatpush3.bf16.xpose.msra.mxu0 %v335_v19  ;;  %812 = vmatpush3.bf16.xpose.msra.mxu1 %v381_v20 }
  0x1d   : > { %807 = vmatprep.mubr.msk.bf16.mxu0 %vm879_vm0, %v878_v0  ;;  %813 = vmatprep.mubr.msk.bf16.mxu1 %vm879_vm0, %v878_v0 }
  0x1e   : > { %817 = vmatprep.subr.bf16.mxu0 %v878_v0  ;;  %823 = vmatprep.subr.bf16.mxu1 %v878_v0 }
  0x23   : > { %808 = vmatmul.mubr.msk.bf16.vlgmr.msra.gmra.mrb[4].mxu0 %vm238_vm1, %v220_v23  ;;  %814 = vmatmul.mubr.msk.bf16.vlgmr.msra.gmra.mrb[4].mxu1 %vm238_vm1, %v221_v24 }
  0x24   : > { %819 = vmatprep.mubr.msk.bf16.mxu0 %vm879_vm0, %v878_v0  ;;  %825 = vmatprep.mubr.msk.bf16.mxu1 %vm879_vm0, %v878_v0 }
  0x25   : > { %818 = vmatpush3.bf16.msra.mxu0 %v476_v4  ;;  %824 = vmatpush3.bf16.msra.mxu1 %v522_v7 }
  0x26   : > { %829 = vmatprep.subr.bf16.mxu0 %v878_v0  ;;  %835 = vmatprep.subr.bf16.mxu1 %v878_v0 }
  0xee   : > { %v279_v25 = vpop.f32.mrb[0].mxu0  ;;  %v325_v26 = vpop.f32.mrb[0].mxu1 }
  0xef   : > { %v797_v27 = vpop.f32.mrb[1].mxu0  ;;  %v423_v28 = vsel %vm238_vm1, %v279_v25, -inf  ;;  %v803_v29 = vpop.f32.mrb[1].mxu1  ;;  %v426_v34 = vsel %vm238_vm1, %v325_v26, -inf }
  0xf0   : > { %424 = vmax.xlane.f32.xlu0 %v423_v28  ;;  %v282_v30 = vpop.f32.mrb[2].mxu0  ;;  %v328_v31 = vpop.f32.mrb[2].mxu1 }
  0xf1   : > { %v798_v32 = vpop.f32.mrb[3].mxu0  ;;  %v804_v33 = vpop.f32.mrb[3].mxu1 }
  0xf4   : > { %427 = vmax.xlane.f32.xlu0 %v426_v34 }
  0xf6   : > { %v371_v35 = vpop.f32.mrb[4].mxu0  ;;  %v417_v36 = vpop.f32.mrb[4].mxu1 }
  0xf7   : > { %v809_v37 = vpop.f32.mrb[5].mxu0  ;;  %v429_v38 = vsel %vm238_vm1, %v371_v35, -inf  ;;  %v815_v39 = vpop.f32.mrb[5].mxu1  ;;  %v432_v44 = vsel %vm238_vm1, %v417_v36, -inf }
  0xf8   : > { %430 = vmax.xlane.f32.xlu1 %v429_v38  ;;  %v374_v40 = vpop.f32.mrb[6].mxu0  ;;  %v420_v41 = vpop.f32.mrb[6].mxu1 }
  0xf9   : > { %v810_v42 = vpop.f32.mrb[7].mxu0  ;;  %v816_v43 = vpop.f32.mrb[7].mxu1 }
  0xfc   : > { %433 = vmax.xlane.f32.xlu1 %v432_v44 }
 0x17d   : > { %v425_v45 = vpop.xlane.xlu0 %424 }
 0x17e   : > { %v435_v46 = vsub.f32 %v279_v25, %v425_v45 }
 0x180   : > { %v439_v47 = vmul.f32 1.442695, %v435_v46 }
 0x181   : > { %v428_v48 = vpop.xlane.xlu0 %427 }
 0x182   : > { %854 = vpow2.f32 %v439_v47  ;;  %v436_v49 = vsub.f32 %v325_v26, %v428_v48 }
 0x184   : > { %v441_v50 = vmul.f32 1.442695, %v436_v49 }
 0x185   : > { %v431_v51 = vpop.xlane.xlu1 %430 }
 0x186   : > { %856 = vpow2.f32 %v441_v50  ;;  %v437_v52 = vsub.f32 %v371_v35, %v431_v51 }
 0x188   : > { %v443_v53 = vmul.f32 1.442695, %v437_v52 }
 0x189   : > { %v434_v54 = vpop.xlane.xlu1 %433 }
 0x18a   : > { %858 = vpow2.f32 %v443_v53  ;;  %v438_v55 = vsub.f32 %v417_v36, %v434_v54 }
 0x18c   : > { %v855_v56 = vpop.eup %854  ;;  %v445_v57 = vmul.f32 1.442695, %v438_v55 }
 0x18d   : > { %v447_v58 = vsel %vm238_vm1, %v855_v56, 0.0 }
 0x18e   : > { %860 = vpow2.f32 %v445_v57  ;;  %448 = vadd.xlane.f32.xlu0 %v447_v58 }
 0x190   : > { %v857_v59 = vpop.eup %856 }
 0x191   : > { %v450_v60 = vsel %vm238_vm1, %v857_v59, 0.0 }
 0x192   : > { %451 = vadd.xlane.f32.xlu1 %v450_v60 }
 0x194   : > { %v859_v61 = vpop.eup %858 }
 0x195   : > { %v453_v62 = vsel %vm238_vm1, %v859_v61, 0.0 }
 0x196   : > { %454 = vadd.xlane.f32.xlu0 %v453_v62 }
 0x198   : > { %v861_v63 = vpop.eup %860 }
 0x199   : > { %v456_v1 = vsel %vm238_vm1, %v861_v63, 0.0 }
 0x19a   : > { %457 = vadd.xlane.f32.xlu1 %v456_v1 }
 0x21b   : > { %v449_v14 = vpop.xlane.xlu0 %448 }
 0x21c   : > { %862 = vrcp.f32 %v449_v14 }
 0x21f   : > { %v452_v15 = vpop.xlane.xlu1 %451 }
 0x220   : > { %864 = vrcp.f32 %v452_v15 }
 0x223   : > { %v455_v16 = vpop.xlane.xlu0 %454 }
 0x224   : > { %866 = vrcp.f32 %v455_v16 }
 0x226   : > { %v863_v17 = vpop.eup %862 }
 0x227   : > { %v463_v18 = vmul.f32 %v863_v17, %v855_v56  ;;  %v458_v19 = vpop.xlane.xlu1 %457 }
 0x228   : > { %868 = vrcp.f32 %v458_v19 }
 0x229   : > { %v467_v20 = vpack.c.bf16 %v463_v18, %v463_v18 }
 0x22a   : > { %v865_v21 = vpop.eup %864 }
 0x22b   : > { %v464_v22 = vmul.f32 %v865_v21, %v857_v59  ;;  %820 = vmatmul.mubr.msk.bf16.vlgmr.msra.gmra.mrb[8].mxu0 %vm238_vm1, %v467_v20 }
 0x22c   : > { %830 = vmatpush3.bf16.msra.mxu0 %v568_v10  ;;  %831 = vmatprep.mubr.msk.bf16.mxu0 %vm879_vm0, %v878_v0 }
 0x22d   : > { %v468_v23 = vpack.c.bf16 %v464_v22, %v464_v22 }
 0x22e   : > { %v867_v24 = vpop.eup %866 }
 0x22f   : > { %v465_v25 = vmul.f32 %v867_v24, %v859_v61  ;;  %826 = vmatmul.mubr.msk.bf16.vlgmr.msra.gmra.mrb[8].mxu1 %vm238_vm1, %v468_v23 }
 0x230   : > { %836 = vmatpush3.bf16.msra.mxu1 %v614_v13  ;;  %837 = vmatprep.mubr.msk.bf16.mxu1 %vm879_vm0, %v878_v0 }
 0x231   : > { %v469_v26 = vpack.c.bf16 %v465_v25, %v465_v25 }
 0x232   : > { %v869_v27 = vpop.eup %868 }
 0x233   : > { %v466_v28 = vmul.f32 %v869_v27, %v861_v63  ;;  %832 = vmatmul.mubr.msk.bf16.vlgmr.msra.gmra.mrb[12].mxu0 %vm238_vm1, %v469_v26 }
 0x235   : > { %v470_v29 = vpack.c.bf16 %v466_v28, %v466_v28 }
 0x237   : > { %838 = vmatmul.mubr.msk.bf16.vlgmr.msra.gmra.mrb[12].mxu1 %vm238_vm1, %v470_v29 }
 0x2fe   : > { %v512_v30 = vpop.f32.mrb[8].mxu0 }
 0x2ff   : > { %v821_v31 = vpop.f32.mrb[9].mxu0 }
 0x300   : > { %v515_v32 = vpop.f32.mrb[10].mxu0 }
 0x301   : > { %v822_v33 = vpop.f32.mrb[11].mxu0 }
 0x302   : > { %v558_v34 = vpop.f32.mrb[8].mxu1 }
 0x303   : > { %657 = vrot.lane.b32.xlu0 %v558_v34, %s880_s24  ;;  %v827_v35 = vpop.f32.mrb[9].mxu1 }
 0x304   : > { %v561_v36 = vpop.f32.mrb[10].mxu1 }
 0x305   : > { %v828_v37 = vpop.f32.mrb[11].mxu1 }
 0x306   : > { %v604_v0 = vpop.f32.mrb[12].mxu0 }
 0x307   : > { %661 = vrot.lane.b32.xlu1 %v604_v0, %s881_s25  ;;  %v833_v38 = vpop.f32.mrb[13].mxu0 }
 0x308   : > { %v607_v39 = vpop.f32.mrb[14].mxu0 }
 0x309   : > { %v834_v40 = vpop.f32.mrb[15].mxu0 }
 0x30a   : > { %v650_v41 = vpop.f32.mrb[12].mxu1 }
 0x30b   : > { %v839_v42 = vpop.f32.mrb[13].mxu1  ;;  %665 = vrot.lane.b32.xlu1 %v650_v41, %s882_s26 }
 0x30c   : > { %v653_v43 = vpop.f32.mrb[14].mxu1 }
 0x30d   : > { %v840_v44 = vpop.f32.mrb[15].mxu1 }
 0x375   : > { %v658_v45 = vpop.permute.xlu0 %657 }
 0x376   : > { %v668_v47 = vsel %vm238_vm1, %v512_v30, %v658_v45 }
 0x379   : > { %v662_v46 = vpop.permute.xlu1 %661 }
 0x37a   : > { %v670_v48 = vsel %vm669_vm3, %v668_v47, %v662_v46 }
 0x37d   : > { %v666_v49 = vpop.permute.xlu1 %665 }
 0x37e   : > { %v672_v50 = vsel %vm671_vm4, %v670_v48, %v666_v49 }
 0x37f   : > { %674 = vst.msk [vmem:[%s208_s30] sm:$0xff] %vm673_vm5, %v672_v50 }
 0x380 PF: > { %s13_s12 = sadd.s32 1, %s876_s12  }
 0x381   : > { %p10_p4 = scmp.ge.s32.totalorder %s13_s12, 4  }
 0x383   :  { %12 = sbr.rel (!%p10_p4) target bundleno = 1 (0x1), region = 68 }

</bundles_post_ra>
